<compile_context>
chip_gen: v6e
topology: v6e:2x2x1
jax: 0.10.0
libtpu: 0.0.40
codegen_flags: <defaults>
</compile_context>

<pallas_src>
import jax
import jax.numpy as jnp
from jax.experimental import pallas as pl
from jax.experimental.pallas import tpu as pltpu


def _round_up(x, m):
    return ((x + m - 1) // m) * m


def _cdiv(a, b):
    return (a + b - 1) // b


def _vmem_capacity_bytes():
    """Per-core VMEM capacity; conservative fallback if the query fails."""
    try:
        info = pltpu.get_tpu_info()
        cap = getattr(info, "vmem_capacity_bytes", None)
        if cap:
            return int(cap)
    except Exception:
        pass
    return 64 * 1024 * 1024  # v7x per-TensorCore figure (smallest generation)


# ---------------------------------------------------------------------------
# Fast path: whole problem as a single VMEM block (no grid / scratch / when).
# This is the path the actual MF module sizes take; it is launch-bound, so it
# is kept as bare as possible.
# ---------------------------------------------------------------------------
def _mf_single_block_kernel(cfs_ref, cmps_ref, out_ref):
    out_ref[...] = jnp.dot(
        cfs_ref[...], cmps_ref[...], preferred_element_type=jnp.float32
    ).astype(out_ref.dtype)


def _mf_single_block(cfs, cmps):
    M, K = cfs.shape
    _, N = cmps.shape
    cost = pl.CostEstimate(
        flops=2 * M * N * K,
        transcendentals=0,
        bytes_accessed=4 * (M * K + K * N + M * N),
    )
    return pl.pallas_call(
        _mf_single_block_kernel,
        out_shape=jax.ShapeDtypeStruct((M, N), cfs.dtype),
        in_specs=[
            pl.BlockSpec(memory_space=pltpu.MemorySpace.VMEM),
            pl.BlockSpec(memory_space=pltpu.MemorySpace.VMEM),
        ],
        out_specs=pl.BlockSpec(memory_space=pltpu.MemorySpace.VMEM),
        cost_estimate=cost,
    )(cfs, cmps)


# ---------------------------------------------------------------------------
# Tiled fallback for large MF configurations.
# ---------------------------------------------------------------------------
def _mf_tiled_noacc_kernel(cfs_ref, cmps_ref, out_ref):
    # K fits in one tile: no accumulator, no init/finalize predicates.
    out_ref[...] = jnp.dot(
        cfs_ref[...], cmps_ref[...], preferred_element_type=jnp.float32
    ).astype(out_ref.dtype)


def _mf_tiled_acc_kernel(cfs_ref, cmps_ref, out_ref, acc_ref):
    @pl.when(pl.program_id(2) == 0)
    def _():
        acc_ref[...] = jnp.zeros_like(acc_ref)

    acc_ref[...] += jnp.dot(
        cfs_ref[...], cmps_ref[...], preferred_element_type=jnp.float32
    )

    @pl.when(pl.program_id(2) == pl.num_programs(2) - 1)
    def _():
        out_ref[...] = acc_ref[...].astype(out_ref.dtype)


def _mf_tiled(cfs, cmps, *, tm=512, tn=1024, tk=1024):
    M, K = cfs.shape
    K2, N = cmps.shape
    assert K == K2, "inner dimensions must match"

    capacity = _vmem_capacity_bytes()

    # Clamp tiles toward the problem while respecting (sublane=8, lane=128).
    tm = min(tm, _round_up(M, 8))     # always a multiple of 8
    tn = min(tn, _round_up(N, 128))   # always a multiple of 128 (lane-dense)
    if K <= tk:
        tk = K                        # full-K block: no pad, no accumulator

    # Keep double-buffered A/B/out + f32 accumulator well under per-core VMEM
    # (v7x: 64 MiB; v5e/v6e: 128 MiB).
    def _needed(tm_, tn_, tk_):
        return 8 * (tm_ * tk_ + tk_ * tn_ + tm_ * tn_) + 4 * tm_ * tn_

    for _ in range(8):
        if _needed(tm, tn, tk) <= 0.45 * capacity:
            break
        if tk >= 512 and tk % 256 == 0:
            tk //= 2
        elif tn >= 512 and tn % 256 == 0:
            tn //= 2
        elif tm >= 256 and tm % 16 == 0:
            tm //= 2
        else:
            break

    grid_m, grid_n = _cdiv(M, tm), _cdiv(N, tn)

    # Give megacore chips (v7x: 2 TensorCores) at least 2 parallel tiles.
    if grid_m * grid_n == 1 and N > 128:
        tn = max(128, _round_up(_cdiv(N, 2), 128))
        grid_n = _cdiv(N, tn)

    # Ragged M/N edges are left to Pallas: overhang reads are garbage that
    # only lands in overhang output rows/cols, which are dropped on writeback.
    # Only the K axis must be exact; prefer a tk that divides K, zero-pad K
    # (and only K) otherwise.
    if K <= tk:
        grid_k = 1
    else:
        for cand in range(tk, 255, -128):
            if K % cand == 0:
                tk = cand
                break
        Kp = _round_up(K, tk)
        if Kp != K:
            cfs = jnp.pad(cfs, ((0, 0), (0, Kp - K)))
            cmps = jnp.pad(cmps, ((0, Kp - K), (0, 0)))
            K = Kp
        grid_k = K // tk

    vmem_limit = int(
        min(0.9 * capacity, max(_needed(tm, tn, tk) + (4 << 20), 32 << 20))
    )

    cost = pl.CostEstimate(
        flops=2 * M * N * K,
        transcendentals=0,
        # A is streamed once per N-tile, B once per M-tile.
        bytes_accessed=4 * (M * K * grid_n + K * N * grid_m + M * N),
    )

    if grid_k == 1:
        return pl.pallas_call(
            _mf_tiled_noacc_kernel,
            out_shape=jax.ShapeDtypeStruct((M, N), cfs.dtype),
            grid_spec=pltpu.PrefetchScalarGridSpec(
                num_scalar_prefetch=0,
                grid=(grid_m, grid_n),
                in_specs=[
                    pl.BlockSpec((tm, K), lambda i, j: (i, 0)),
                    pl.BlockSpec((K, tn), lambda i, j: (0, j)),
                ],
                out_specs=pl.BlockSpec((tm, tn), lambda i, j: (i, j)),
            ),
            compiler_params=pltpu.CompilerParams(
                dimension_semantics=("parallel", "parallel"),
                vmem_limit_bytes=vmem_limit,
            ),
            cost_estimate=cost,
        )(cfs, cmps)

    return pl.pallas_call(
        _mf_tiled_acc_kernel,
        out_shape=jax.ShapeDtypeStruct((M, N), cfs.dtype),
        grid_spec=pltpu.PrefetchScalarGridSpec(
            num_scalar_prefetch=0,
            grid=(grid_m, grid_n, grid_k),
            in_specs=[
                pl.BlockSpec((tm, tk), lambda i, j, k: (i, k)),
                pl.BlockSpec((tk, tn), lambda i, j, k: (k, j)),
            ],
            out_specs=pl.BlockSpec((tm, tn), lambda i, j, k: (i, j)),
            scratch_shapes=[pltpu.VMEM((tm, tn), jnp.float32)],
        ),
        compiler_params=pltpu.CompilerParams(
            dimension_semantics=("parallel", "parallel", "arbitrary"),
            vmem_limit_bytes=vmem_limit,
        ),
        cost_estimate=cost,
    )(cfs, cmps)


# Problems whose total f32 footprint is below this go through the degenerate
# single-block fast path (trivially true for the actual MF sizes).  Kept small
# so medium problems reach the tiled path and can use both v7x TensorCores.
_SINGLE_BLOCK_MAX_BYTES = 1 * 1024 * 1024


def mf_forward(cfs, cmps):
    """Compute cfs @ cmps (the MF.forward) with Pallas TPU kernels."""
    M, K = cfs.shape
    K2, N = cmps.shape
    assert K == K2, "inner dimensions must match"
    total_bytes = 4 * (M * K + K * N + M * N)
    if total_bytes <= _SINGLE_BLOCK_MAX_BYTES:
        return _mf_single_block(cfs, cmps)
    return _mf_tiled(cfs, cmps)


if __name__ == "__main__":
    # Module shapes: MF(n_coeffs, n_comps, n_pix)
    n_coeffs, n_comps, n_pix = 16, 32, 128

    key = jax.random.PRNGKey(0)
    k_cfs, k_cmps, k_a, k_b, k_c, k_d = jax.random.split(key, 6)

    # torch.rand -> Uniform[0, 1); reproduce deterministically with JAX PRNG.
    cfs = jax.random.uniform(k_cfs, (n_coeffs, n_comps), dtype=jnp.float32)
    cmps = jax.random.uniform(k_cmps, (n_comps, n_pix), dtype=jnp.float32)

    out = jax.block_until_ready(mf_forward(cfs, cmps))
    ref = jnp.dot(cfs, cmps, precision=jax.lax.Precision.HIGHEST)
    assert out.shape == (n_coeffs, n_pix)
    assert jnp.allclose(out, ref, atol=1e-4, rtol=1e-5)

    # Tiled fallback, grid_k == 1 branch, ragged M and N edges (no padding).
    a = jax.random.uniform(k_a, (520, 384), dtype=jnp.float32)
    b = jax.random.uniform(k_b, (384, 2100), dtype=jnp.float32)
    out2 = jax.block_until_ready(_mf_tiled(a, b))
    ref2 = jnp.dot(a, b, precision=jax.lax.Precision.HIGHEST)
    assert jnp.allclose(out2, ref2, atol=2e-2, rtol=2e-3)

    # Tiled fallback, K-accumulation branch (grid_k > 1) with ragged N edge.
    c = jax.random.uniform(k_c, (200, 1536), dtype=jnp.float32)
    d = jax.random.uniform(k_d, (1536, 1300), dtype=jnp.float32)
    out3 = jax.block_until_ready(_mf_tiled(c, d))
    ref3 = jnp.dot(c, d, precision=jax.lax.Precision.HIGHEST)
    assert jnp.allclose(out3, ref3, atol=2e-2, rtol=2e-3)

    print("KERNEL_OK")
</pallas_src>

<mosaic_0001>
module attributes {stable_mosaic.version = 11 : i64} {
  func.func @_mf_single_block_kernel(%arg0: memref<16x32xf32, #tpu.memory_space<vmem>>, %arg1: memref<32x128xf32, #tpu.memory_space<vmem>>, %arg2: memref<16x128xf32, #tpu.memory_space<vmem>>) attributes {dimension_semantics = [], scalar_prefetch = 0 : i64, scratch_operands = 0 : i64, tpu.core_type = #tpu.core_type<tc>} {
    %c0 = arith.constant 0 : index
    %c0_0 = arith.constant 0 : index
    %0 = vector.load %arg0[%c0, %c0_0] : memref<16x32xf32, #tpu.memory_space<vmem>>, vector<16x32xf32>
    %c0_1 = arith.constant 0 : index
    %c0_2 = arith.constant 0 : index
    %1 = vector.load %arg1[%c0_1, %c0_2] : memref<32x128xf32, #tpu.memory_space<vmem>>, vector<32x128xf32>
    %cst = arith.constant dense<0.000000e+00> : vector<16x128xf32>
    %2 = tpu.matmul %0, %1, %cst {dimension_numbers = #tpu.dot_dimension_numbers<[1], [0], [0], [1], [0, 0, 1, 1], [], []>} : vector<16x32xf32>, vector<32x128xf32>, vector<16x128xf32> -> vector<16x128xf32>
    %c0_3 = arith.constant 0 : index
    %c0_4 = arith.constant 0 : index
    %3 = vector.load %arg2[%c0_3, %c0_4] : memref<16x128xf32, #tpu.memory_space<vmem>>, vector<16x128xf32>
    tpu.vector_store %arg2[%c0_3, %c0_4], %2 {strides = array<i32>} : memref<16x128xf32, #tpu.memory_space<vmem>>, vector<16x128xf32>,
    return
  }
}

</mosaic_0001>

<bundles_post_ra>
// kernel: tpu_custom_call.1
= control target key start
LH: loop header
LB: loop body
LE: loop exit
PB: predicated region body
PF: predicated region fallthrough
CT: control target
= control target key end

     0   :  { %7 = vsyncpa [#allocation3], 0  ;;  %s278_s0 = inlined_call_operand.hbm [shape: f32[16,32], index: 0, kind: input, shape index: {}]   ;;  %s279_s1 = inlined_call_operand.hbm [shape: f32[32,128], index: 1, kind: input, shape index: {}]   ;;  %s280_s2 = inlined_call_operand.hbm [shape: f32[16,128], index: 2, kind: output, shape index: {}]  }
   0x1   :  { %8 = vsyncpa [#allocation6], 0 }
   0x2   :  { %9 = vsyncpa [#allocation4], 0  ;;  %s238_s9 = smov [#allocation2]  }
   0x3   :  { %s15_s10 = sshll.u32 %s238_s9, 4  ;;  %s16_s10 = int_to_ptr.vmem [resolvable:$true] %s15_s10 }
   0x4   :  { %s180_s11 = scalar_lea.vmem %s16_s10, 256  ;;  %p185_p1 = scmp.lt.s32.totalorder %s16_s10, %s16_s10 }
   0x5   :  { %p181_p0 = scmp.ne.s32.totalorder %s16_s10, %s180_s11  ;;  %p186_p2 = scmp.lt.s32.totalorder %s180_s11, %s180_s11 }
   0x7   :  { %p187_p3 = por %p186_p2, %p185_p1 }
   0x9   :  { %p188_p4 = pnand %p187_p3, %p181_p0 }
   0xb   :  { %191 = shalt.err (!%p188_p4)
}
   0xc   :  { %s239_s12 = smov 128   ;;  %s240_s13 = smov 8  }
   0xd   :  { %21 = dma.hbm_to_vmem [thread:$0]  %s278_s0, 256, %s16_s10, [#allocation3], %s239_s12, %s239_s12, %s240_s13  }
   0xe   :  { %s241_s16 = smov [#allocation5]  }
   0xf   :  { %s27_s17 = sshll.u32 %s241_s16, 4  ;;  %s28_s17 = int_to_ptr.vmem [resolvable:$true] %s27_s17 }
  0x10   :  { %s200_s18 = scalar_lea.vmem %s28_s17, 512  ;;  %p205_p6 = scmp.lt.s32.totalorder %s28_s17, %s28_s17 }
  0x11   :  { %p201_p5 = scmp.ne.s32.totalorder %s28_s17, %s200_s18  ;;  %p206_p7 = scmp.lt.s32.totalorder %s200_s18, %s200_s18 }
  0x13   :  { %p207_p8 = por %p206_p7, %p205_p6 }
  0x15   :  { %p208_p9 = pnand %p207_p8, %p201_p5 }
  0x17   :  { %211 = shalt.err (!%p208_p9)
}
  0x18   :  { %33 = dma.hbm_to_vmem [thread:$0]  %s279_s1, 512, %s28_s17, [#allocation6], %s239_s12, %s239_s12, %s240_s13  }
  0x19   :  { %232 = dma.done.wait [#allocation3], 256  }
  0x1a   :  { %233 = vsyncadd [#allocation3], 4294967040 }
  0x1b   :  { %234 = dma.done.wait [#allocation6], 512  }
  0x1c   :  { %235 = vsyncadd [#allocation6], 4294966784  ;;  %vm46_vm0 = vcmask 261120   ;;  %v45_v0 = vld [vmem:[#allocation5 + $0x18] sm:$0xff]  ;;  %v44_v1 = vld [vmem:[#allocation5 + $0x10] sm:$0xff]  ;;  %s242_s0 = smov [#allocation7]  }
  0x1d   :  { %156 = vmatprep.subr.mxu0 %v45_v0  ;;  %v40_v2 = vld [vmem:[#allocation2] sm:$0xff]  ;;  %v43_v3 = vld [vmem:[#allocation5 + $0x8] sm:$0xff]  ;;  %v42_v4 = vld [vmem:[#allocation5] sm:$0xff]  ;;  %s135_s1 = sshll.u32 %s242_s0, 4  ;;  %s136_s1 = int_to_ptr.vmem [resolvable:$true] %s135_s1 }
  0x1e   :  { %157 = vmatpush3.msra.mxu0 %v45_v0  ;;  %164 = vmatprep.mubr.msk.f32.mxu0 %vm46_vm0, %v40_v2  ;;  %v41_v5 = vld [vmem:[#allocation2 + $0x8] sm:$0xff]  ;;  %s212_s21 = scalar_lea.vmem %s136_s1, 256  ;;  %p217_p11 = scmp.lt.s32.totalorder %s136_s1, %s136_s1 }
  0x1f   :  { %158 = vmatprep.subr.mxu0 %v44_v1  ;;  %p213_p10 = scmp.ne.s32.totalorder %s136_s1, %s212_s21  ;;  %p218_p12 = scmp.lt.s32.totalorder %s212_s21, %s212_s21 }
  0x20   :  { %159 = vmatpush3.msra.mxu0 %v44_v1 }
  0x21   :  { %160 = vmatprep.subr.mxu0 %v43_v3  ;;  %p219_p13 = por %p218_p12, %p217_p11 }
  0x22   :  { %161 = vmatpush3.msra.mxu0 %v43_v3 }
  0x23   :  { %162 = vmatprep.subr.mxu0 %v42_v4  ;;  %p220_p0 = pnand %p219_p13, %p213_p10 }
  0x24   :  { %163 = vmatpush3.msra.mxu0 %v42_v4 }
  0x25   :  { %165 = vmatmul.mubr.msk.f32.vlgmr.msra.gmra.mxu0 %vm46_vm0, %v41_v5 }
  0xe5   :  { %v166_v6 = vpop.f32.mrf.mxu0 }
  0xe6   :  { %129 = vst [vmem:[#allocation7 + $0x8] sm:$0xff] %v166_v6 }
  0xe7   :  { %v119_v7 = vpop.f32.mrf.mxu0 }
  0xe8   :  { %128 = vst [vmem:[#allocation7] sm:$0xff] %v119_v7 }
  0xe9   :  { %223 = shalt.err (!%p220_p0)
}
  0xea   :  { %141 = dma.vmem_to_hbm [thread:$0]  %s136_s1, 256, %s280_s2, [#allocation4], %s239_s12, %s239_s12, %s240_s13  }
  0xeb   :  { %236 = dma.done.wait [#allocation4], 256  }
  0xec   :  { %237 = vsyncadd [#allocation4], 4294967040 }
  0xed   :  { %145 = vsyncpa [#allocation3], 1 }
  0xee   :  { %146 = vsyncpa [#allocation6], 1 }
  0xef   :  { %147 = vsyncpa [#allocation4], 1 }

</bundles_post_ra>
